<compile_context>
chip_gen: v7x
topology: tpu7x:2x2x1
jax: 0.10.0
libtpu: 0.0.40
codegen_flags: <defaults>
</compile_context>

<pallas_src>
import jax
import jax.numpy as jnp
from jax import lax
from jax.experimental import pallas as pl
from jax.experimental.pallas import tpu as pltpu


def _linear_kernel_single_k(x_ref, w_ref, o_ref):
    # x_ref: (tm, K), w_ref: (tn, K)  ->  o_ref: (tm, tn) = x @ w.T
    o_ref[...] = lax.dot_general(
        x_ref[...],
        w_ref[...],
        dimension_numbers=(((1,), (1,)), ((), ())),
        preferred_element_type=jnp.float32,
    ).astype(o_ref.dtype)


def _linear_kernel_acc(x_ref, w_ref, o_ref, acc_ref):
    # grid = (M//tm, N//tn, K//tk); K is the reduction ("arbitrary") axis.
    @pl.when(pl.program_id(2) == 0)
    def _():
        acc_ref[...] = jnp.zeros_like(acc_ref)

    acc_ref[...] += lax.dot_general(
        x_ref[...],
        w_ref[...],
        dimension_numbers=(((1,), (1,)), ((), ())),
        preferred_element_type=jnp.float32,
    )

    @pl.when(pl.program_id(2) == pl.num_programs(2) - 1)
    def _():
        o_ref[...] = acc_ref[...].astype(o_ref.dtype)


def _round_up(a, m):
    return (a + m - 1) // m * m


def _pad2d(a, rows, cols):
    pr, pc = rows - a.shape[0], cols - a.shape[1]
    if pr == 0 and pc == 0:
        return a
    return jnp.pad(a, ((0, pr), (0, pc)))


def low_rank_projection(
    x,
    weight,
    *,
    tm_max=256,
    tn_max=256,
    tk_max=1024,
    single_k_vmem_budget=24 * 1024 * 1024,
):
    """y = x @ weight.T  (nn.Linear with bias=False).

    x:      (..., input_dim)
    weight: (output_dim, input_dim)  -- PyTorch Linear convention (not transposed)
    """
    in_dim = x.shape[-1]
    out_dim, w_in_dim = weight.shape
    assert w_in_dim == in_dim, "weight must be (output_dim, input_dim)"
    lead_shape = x.shape[:-1]

    x2d = x.reshape(-1, in_dim)  # (M, K)
    M, K = x2d.shape
    N = out_dim

    itemsize = jnp.dtype(x.dtype).itemsize
    # Sublane packing multiple: 8 for f32, 16 for bf16, 32 for int8/fp8.
    sub = max(8, 32 // itemsize)

    # MXU-aligned tiles, shrunk (but kept aligned) for small problems.
    tm = min(tm_max, _round_up(M, sub))
    tn = min(tn_max, _round_up(N, 128))
    M_pad = _round_up(M, tm)
    N_pad = _round_up(N, tn)

    K128 = _round_up(K, 128)
    # Double-buffered working set if K is kept as one tile (no reduction axis).
    ws_single = 2 * (tm + tn) * K128 * itemsize + 2 * tm * tn * itemsize
    use_single_k = ws_single <= single_k_vmem_budget

    tk = K128 if use_single_k else min(tk_max, K128)
    K_pad = _round_up(K, tk)

    x_p = _pad2d(x2d, M_pad, K_pad)
    w_p = _pad2d(weight, N_pad, K_pad)

    vmem_limit = 48 * 1024 * 1024  # < v7x's 64 MiB physical; plenty on v5e/v6e

    if use_single_k:
        # Pure streaming matmul: no accumulator, no output revisits.
        out = pl.pallas_call(
            _linear_kernel_single_k,
            out_shape=jax.ShapeDtypeStruct((M_pad, N_pad), x.dtype),
            grid_spec=pltpu.PrefetchScalarGridSpec(
                num_scalar_prefetch=0,
                grid=(M_pad // tm, N_pad // tn),
                in_specs=[
                    pl.BlockSpec((tm, K_pad), lambda i, j: (i, 0)),
                    pl.BlockSpec((tn, K_pad), lambda i, j: (j, 0)),
                ],
                out_specs=pl.BlockSpec((tm, tn), lambda i, j: (i, j)),
            ),
            compiler_params=pltpu.CompilerParams(
                dimension_semantics=("parallel", "parallel"),
                vmem_limit_bytes=vmem_limit,
            ),
        )(x_p, w_p)
    else:
        # Large-K fallback: canonical accumulator matmul, reduction axis last.
        out = pl.pallas_call(
            _linear_kernel_acc,
            out_shape=jax.ShapeDtypeStruct((M_pad, N_pad), x.dtype),
            grid_spec=pltpu.PrefetchScalarGridSpec(
                num_scalar_prefetch=0,
                grid=(M_pad // tm, N_pad // tn, K_pad // tk),
                in_specs=[
                    pl.BlockSpec((tm, tk), lambda i, j, k: (i, k)),
                    pl.BlockSpec((tn, tk), lambda i, j, k: (j, k)),
                ],
                out_specs=pl.BlockSpec((tm, tn), lambda i, j, k: (i, j)),
                scratch_shapes=[pltpu.VMEM((tm, tn), jnp.float32)],
            ),
            compiler_params=pltpu.CompilerParams(
                dimension_semantics=("parallel", "parallel", "arbitrary"),
                vmem_limit_bytes=vmem_limit,
            ),
        )(x_p, w_p)

    out = out[:M, :N]
    return out.reshape(*lead_shape, N)


if __name__ == "__main__":
    # Small shapes consistent with the module: batch=2, seq=8, 128 -> 64.
    # (OUT_DIM=64 and M=16 deliberately exercise the padding / sub-max tiles.)
    B, S, IN_DIM, OUT_DIM = 2, 8, 128, 64

    key = jax.random.PRNGKey(0)
    kx, kw = jax.random.split(key)

    x = jax.random.normal(kx, (B, S, IN_DIM), dtype=jnp.float32)
    # Deterministic "Kaiming-uniform-like" init for nn.Linear weight (out, in).
    bound = 1.0 / (IN_DIM ** 0.5)
    weight = jax.random.uniform(
        kw, (OUT_DIM, IN_DIM), minval=-bound, maxval=bound, dtype=jnp.float32
    )

    y = low_rank_projection(x, weight)
    y = jax.block_until_ready(y)

    # Sanity check against a high-precision JAX reference of nn.Linear.
    y_ref = jnp.einsum("bsi,oi->bso", x, weight, precision=lax.Precision.HIGHEST)
    assert y.shape == (B, S, OUT_DIM)
    assert jnp.allclose(y, y_ref, atol=1e-4, rtol=1e-4), float(
        jnp.max(jnp.abs(y - y_ref))
    )

    print("KERNEL_OK")
</pallas_src>

<mosaic_0001>
module attributes {stable_mosaic.version = 11 : i64} {
  func.func @_linear_kernel_single_k(%arg0: i32, %arg1: i32, %arg2: memref<16x128xf32, #tpu.memory_space<vmem>>, %arg3: memref<128x128xf32, #tpu.memory_space<vmem>>, %arg4: memref<16x128xf32, #tpu.memory_space<vmem>>) attributes {dimension_semantics = [#tpu.dimension_semantics<parallel>, #tpu.dimension_semantics<parallel>], iteration_bounds = array<i64: 1, 1>, scalar_prefetch = 0 : i64, scratch_operands = 0 : i64, tpu.core_type = #tpu.core_type<tc>, window_params = [{transform_indices = @transform_0, window_bounds = array<i64: 16, 128>}, {transform_indices = @transform_1, window_bounds = array<i64: 128, 128>}, {transform_indices = @transform_2, window_bounds = array<i64: 16, 128>}]} {
    %c0 = arith.constant 0 : index
    %c0_0 = arith.constant 0 : index
    %0 = vector.load %arg2[%c0, %c0_0] : memref<16x128xf32, #tpu.memory_space<vmem>>, vector<16x128xf32>
    %c0_1 = arith.constant 0 : index
    %c0_2 = arith.constant 0 : index
    %1 = vector.load %arg3[%c0_1, %c0_2] : memref<128x128xf32, #tpu.memory_space<vmem>>, vector<128x128xf32>
    %cst = arith.constant dense<0.000000e+00> : vector<16x128xf32>
    %2 = tpu.matmul %0, %1, %cst {dimension_numbers = #tpu.dot_dimension_numbers<[1], [1], [0], [0], [0, 0, 1, 0], [], []>} : vector<16x128xf32>, vector<128x128xf32>, vector<16x128xf32> -> vector<16x128xf32>
    %c0_3 = arith.constant 0 : index
    %c0_4 = arith.constant 0 : index
    %3 = vector.load %arg4[%c0_3, %c0_4] : memref<16x128xf32, #tpu.memory_space<vmem>>, vector<16x128xf32>
    tpu.vector_store %arg4[%c0_3, %c0_4], %2 {strides = array<i32>} : memref<16x128xf32, #tpu.memory_space<vmem>>, vector<16x128xf32>,
    return
  }
  func.func @transform_0(%arg0: i32, %arg1: i32) -> (i32, i32) {
    %c0_i32 = arith.constant 0 : i32
    %c0_i32_0 = arith.constant 0 : i32
    return %arg0, %c0_i32 : i32, i32
  }
  func.func @transform_1(%arg0: i32, %arg1: i32) -> (i32, i32) {
    %c0_i32 = arith.constant 0 : i32
    %c0_i32_0 = arith.constant 0 : i32
    return %arg1, %c0_i32 : i32, i32
  }
  func.func @transform_2(%arg0: i32, %arg1: i32) -> (i32, i32) {
    %c0_i32 = arith.constant 0 : i32
    return %arg0, %arg1 : i32, i32
  }
}

</mosaic_0001>

<bundles_post_ra>
// kernel: tpu_custom_call.1
= control target key start
LH: loop header
LB: loop body
LE: loop exit
PB: predicated region body
PF: predicated region fallthrough
CT: control target
= control target key end

     0   :  { %7 = vsyncpa [#allocation3], 0  ;;  %s380_s0 = inlined_call_operand.hbm [shape: f32[16,128], index: 0, kind: input, shape index: {}]   ;;  %s381_s1 = inlined_call_operand.hbm [shape: f32[128,128], index: 1, kind: input, shape index: {}]   ;;  %s382_s2 = inlined_call_operand.hbm [shape: f32[16,128], index: 2, kind: output, shape index: {}]  }
   0x1   :  { %8 = vsyncpa [#allocation6], 0 }
   0x2   :  { %9 = vsyncpa [#allocation4], 0  ;;  %s315_s9 = smov [#allocation2]   ;;  %s243_s13 = scalar_lea.hbm %s380_s0, 256 }
   0x3   :  { %s15_s10 = sshll.u32 %s315_s9, 4  ;;  %p244_p0 = scmp.ne.s32.totalorder %s380_s0, %s243_s13  ;;  %s16_s10 = int_to_ptr.vmem [resolvable:$true] %s15_s10 }
   0x4   :  { %p247_p1 = scmp.lt.u32.totalorder %s243_s13, %s380_s0 }
   0x6   :  { %p249_p2 = pnand %p247_p1, %p244_p0 }
   0x8   :  { %252 = shalt.err (!%p249_p2)
}
   0x9   :  { %s253_s18 = scalar_lea.vmem %s16_s10, 256  ;;  %p258_p4 = scmp.lt.s32.totalorder %s16_s10, %s16_s10 }
   0xa   :  { %p254_p3 = scmp.ne.s32.totalorder %s16_s10, %s253_s18  ;;  %p259_p5 = scmp.lt.s32.totalorder %s253_s18, %s253_s18 }
   0xc   :  { %p260_p6 = por %p259_p5, %p258_p4 }
   0xe   :  { %p261_p7 = pnand %p260_p6, %p254_p3 }
  0x10   :  { %264 = shalt.err (!%p261_p7)
}
  0x11   :  { %s316_s19 = smov 128   ;;  %s317_s20 = smov 8  }
  0x12   :  { %21 = dma.hbm_to_vmem [thread:$0]  %s380_s0, 256, %s16_s10, [#allocation3], %s316_s19, %s316_s19, %s317_s20  }
  0x13   :  { %s318_s23 = smov [#allocation5]   ;;  %s265_s27 = scalar_lea.hbm %s381_s1, 2048 }
  0x14   :  { %s27_s24 = sshll.u32 %s318_s23, 4  ;;  %p266_p8 = scmp.ne.s32.totalorder %s381_s1, %s265_s27  ;;  %s28_s24 = int_to_ptr.vmem [resolvable:$true] %s27_s24 }
  0x15   :  { %p269_p9 = scmp.lt.u32.totalorder %s265_s27, %s381_s1 }
  0x17   :  { %p271_p10 = pnand %p269_p9, %p266_p8 }
  0x19   :  { %274 = shalt.err (!%p271_p10)
}
  0x1a   :  { %s275_s4 = scalar_lea.vmem %s28_s24, 2048  ;;  %p280_p12 = scmp.lt.s32.totalorder %s28_s24, %s28_s24 }
  0x1b   :  { %p276_p11 = scmp.ne.s32.totalorder %s28_s24, %s275_s4  ;;  %p281_p13 = scmp.lt.s32.totalorder %s275_s4, %s275_s4 }
  0x1d   :  { %p282_p0 = por %p281_p13, %p280_p12 }
  0x1f   :  { %p283_p1 = pnand %p282_p0, %p276_p11 }
  0x21   :  { %286 = shalt.err (!%p283_p1)
}
  0x22   :  { %33 = dma.hbm_to_vmem [thread:$0]  %s381_s1, 2048, %s28_s24, [#allocation6], %s316_s19, %s316_s19, %s317_s20  }
  0x23   :  { %309 = dma.done.wait [#allocation3], 256  }
  0x24   :  { %310 = vsyncadd [#allocation3], 4294967040 }
  0x25   :  { %311 = dma.done.wait [#allocation6], 2048  }
  0x26   :  { %312 = vsyncadd [#allocation6], 4294965248  ;;  %v42_v0 = vld [vmem:[#allocation5] sm:$0xff]  ;;  %v43_v1 = vld [vmem:[#allocation5 + $0x8] sm:$0xff]  ;;  %s319_s1 = smov [#allocation7]  }
  0x27   :  { %v44_v2 = vld [vmem:[#allocation5 + $0x10] sm:$0xff]  ;;  %v206_v3 = vpack.c.bf16 %v43_v1, %v42_v0  ;;  %v45_v4 = vld [vmem:[#allocation5 + $0x18] sm:$0xff]  ;;  %v46_v7 = vld [vmem:[#allocation5 + $0x20] sm:$0xff]  ;;  %s140_s6 = sshll.u32 %s319_s1, 4  ;;  %s141_s6 = int_to_ptr.vmem [resolvable:$true] %s140_s6 }
  0x28   :  { %v210_v5 = vpack.c.bf16 %v45_v4, %v44_v2  ;;  %v40_v6 = vld [vmem:[#allocation2] sm:$0xff]  ;;  %v47_v8 = vld [vmem:[#allocation5 + $0x28] sm:$0xff]  ;;  %v49_v11 = vld [vmem:[#allocation5 + $0x38] sm:$0xff]  ;;  %s287_s7 = scalar_lea.vmem %s141_s6, 256  ;;  %p292_p3 = scmp.lt.s32.totalorder %s141_s6, %s141_s6 }
  0x29   :  { %207 = vmatprep.subr.bf16.mxu0 %v206_v3  ;;  %203 = vmatprep.mubr.f32.mxu0 %v40_v6  ;;  %v214_v9 = vpack.c.bf16 %v47_v8, %v46_v7  ;;  %v48_v10 = vld [vmem:[#allocation5 + $0x30] sm:$0xff]  ;;  %v50_v13 = vld [vmem:[#allocation5 + $0x40] sm:$0xff]  ;;  %v51_v14 = vld [vmem:[#allocation5 + $0x48] sm:$0xff]  ;;  %p288_p2 = scmp.ne.s32.totalorder %s141_s6, %s287_s7  ;;  %p293_p4 = scmp.lt.s32.totalorder %s287_s7, %s287_s7 }
  0x2a   :  { %209 = vmatpush3.bf16.xpose.msra.mxu0 %v206_v3  ;;  %v218_v12 = vpack.c.bf16 %v49_v11, %v48_v10  ;;  %v222_v15 = vpack.c.bf16 %v51_v14, %v50_v13  ;;  %v52_v16 = vld [vmem:[#allocation5 + $0x50] sm:$0xff]  ;;  %v53_v17 = vld [vmem:[#allocation5 + $0x58] sm:$0xff]  ;;  %v54_v19 = vld [vmem:[#allocation5 + $0x60] sm:$0xff] }
  0x2b   :  { %211 = vmatprep.subr.bf16.mxu0 %v210_v5  ;;  %v226_v18 = vpack.c.bf16 %v53_v17, %v52_v16  ;;  %v55_v20 = vld [vmem:[#allocation5 + $0x68] sm:$0xff]  ;;  %v56_v22 = vld [vmem:[#allocation5 + $0x70] sm:$0xff]  ;;  %v57_v23 = vld [vmem:[#allocation5 + $0x78] sm:$0xff]  ;;  %p294_p5 = por %p293_p4, %p292_p3 }
  0x2c   :  { %v230_v21 = vpack.c.bf16 %v55_v20, %v54_v19  ;;  %v234_v24 = vpack.c.bf16 %v57_v23, %v56_v22  ;;  %v41_v25 = vld [vmem:[#allocation2 + $0x8] sm:$0xff] }
  0x2d   :  { %p295_p6 = pnand %p294_p5, %p288_p2 }
  0x32   :  { %213 = vmatpush3.bf16.xpose.msra.mxu0 %v210_v5 }
  0x33   :  { %215 = vmatprep.subr.bf16.mxu0 %v214_v9 }
  0x3a   :  { %217 = vmatpush3.bf16.xpose.msra.mxu0 %v214_v9 }
  0x3b   :  { %219 = vmatprep.subr.bf16.mxu0 %v218_v12 }
  0x42   :  { %221 = vmatpush3.bf16.xpose.msra.mxu0 %v218_v12 }
  0x43   :  { %223 = vmatprep.subr.bf16.mxu0 %v222_v15 }
  0x4a   :  { %225 = vmatpush3.bf16.xpose.msra.mxu0 %v222_v15 }
  0x4b   :  { %227 = vmatprep.subr.bf16.mxu0 %v226_v18 }
  0x52   :  { %229 = vmatpush3.bf16.xpose.msra.mxu0 %v226_v18 }
  0x53   :  { %231 = vmatprep.subr.bf16.mxu0 %v230_v21 }
  0x5a   :  { %233 = vmatpush3.bf16.xpose.msra.mxu0 %v230_v21 }
  0x5b   :  { %235 = vmatprep.subr.bf16.mxu0 %v234_v24 }
  0x62   :  { %237 = vmatpush3.bf16.xpose.msra.mxu0 %v234_v24 }
  0x69   :  { %204 = vmatmul.mubr.f32.vlgmr.msra.gmra.mrb[0].mxu0 %v41_v25 }
 0x13c   :  { %v205_v26 = vpop.f32.mrb[0].mxu0 }
 0x13d   :  { %134 = vst [vmem:[#allocation7 + $0x8] sm:$0xff] %v205_v26  ;;  %v124_v27 = vpop.f32.mrb[1].mxu0 }
 0x13e   :  { %133 = vst [vmem:[#allocation7] sm:$0xff] %v124_v27 }
 0x13f   :  { %298 = shalt.err (!%p295_p6)
}
 0x140   :  { %s299_s10 = scalar_lea.hbm %s382_s2, 256 }
 0x141   :  { %p300_p7 = scmp.ne.s32.totalorder %s382_s2, %s299_s10  ;;  %p303_p8 = scmp.lt.u32.totalorder %s299_s10, %s382_s2 }
 0x143   :  { %p305_p9 = pnand %p303_p8, %p300_p7 }
 0x145   :  { %308 = shalt.err (!%p305_p9)
}
 0x146   :  { %146 = dma.vmem_to_hbm [thread:$0]  %s141_s6, 256, %s382_s2, [#allocation4], %s316_s19, %s316_s19, %s317_s20  }
 0x147   :  { %313 = dma.done.wait [#allocation4], 256  }
 0x148   :  { %314 = vsyncadd [#allocation4], 4294967040 }
 0x149   :  { %150 = vsyncpa [#allocation3], 1 }
 0x14a   :  { %151 = vsyncpa [#allocation6], 1 }
 0x14b   :  { %152 = vsyncpa [#allocation4], 1 }

</bundles_post_ra>
